<compile_context>
chip_gen: v5e
topology: v5e:2x2
jax: 0.10.0
libtpu: 0.0.40
codegen_flags: <defaults>
</compile_context>

<pallas_src>
import functools

import jax
import jax.numpy as jnp
from jax.experimental import pallas as pl
from jax.experimental.pallas import tpu as pltpu


def _layernorm_kernel(x_ref, gamma_ref, beta_ref, o_ref, *, eps, inv_c):
    # x_ref: (1, C, TL) block in VMEM; normalize over C (axis 1, sublane axis).
    x = x_ref[...].astype(jnp.float32)                      # (1, C, TL)

    # Fused one-pass statistics over the channel axis.
    s1 = jnp.sum(x, axis=1, keepdims=True)                  # (1, 1, TL)
    s2 = jnp.sum(x * x, axis=1, keepdims=True)              # (1, 1, TL)
    mean = s1 * inv_c
    var = jnp.maximum(s2 * inv_c - mean * mean, 0.0)        # biased var (PyTorch LN)
    inv = jax.lax.rsqrt(var + eps)                          # EUP

    gamma = gamma_ref[...].astype(jnp.float32)              # (1, C, 1)
    beta = beta_ref[...].astype(jnp.float32)                # (1, C, 1)

    o_ref[...] = ((x - mean) * inv * gamma + beta).astype(o_ref.dtype)


def _choose_l_tile(C, L, itemsize, target_bytes=2 * 1024 * 1024):
    """Pick an L tile: full L for small inputs, else a multiple of 128 sized
    so one (C, TL) tile stays around ~2 MiB (VMEM-safe under double buffering
    on v5e/v6e/v7x)."""
    if L <= 128:
        return L                                            # full-dim block
    tl = max(1, target_bytes // (itemsize * C))
    tl = max(128, (min(tl, L) // 128) * 128)                # multiple of 128
    return tl


def layernorm1d(x, gamma, beta, eps=1e-5):
    """x: (N, C, L); gamma, beta: (C,). Returns (N, C, L). Normalizes over C."""
    N, C, L = x.shape
    tl = _choose_l_tile(C, L, jnp.dtype(x.dtype).itemsize)
    grid = (N, pl.cdiv(L, tl))

    gamma3 = gamma.reshape(1, C, 1)
    beta3 = beta.reshape(1, C, 1)

    kernel = functools.partial(_layernorm_kernel, eps=float(eps), inv_c=1.0 / C)

    return pl.pallas_call(
        kernel,
        out_shape=jax.ShapeDtypeStruct((N, C, L), x.dtype),
        grid_spec=pltpu.PrefetchScalarGridSpec(
            num_scalar_prefetch=0,
            grid=grid,
            in_specs=[
                pl.BlockSpec((1, C, tl), lambda n, l: (n, 0, l)),
                pl.BlockSpec((1, C, 1), lambda n, l: (0, 0, 0)),
                pl.BlockSpec((1, C, 1), lambda n, l: (0, 0, 0)),
            ],
            out_specs=pl.BlockSpec((1, C, tl), lambda n, l: (n, 0, l)),
        ),
        compiler_params=pltpu.CompilerParams(
            dimension_semantics=("parallel", "parallel"),
            vmem_limit_bytes=32 * 1024 * 1024,
        ),
    )(x, gamma3, beta3)


def _reference(x, gamma, beta, eps=1e-5):
    # Pure-JAX reference of the PyTorch module (two-pass, f32).
    x_t = jnp.transpose(x, (0, 2, 1)).astype(jnp.float32)
    mean = jnp.mean(x_t, axis=-1, keepdims=True)
    var = jnp.mean((x_t - mean) ** 2, axis=-1, keepdims=True)
    y = (x_t - mean) / jnp.sqrt(var + eps)
    y = y * gamma + beta
    return jnp.transpose(y, (0, 2, 1)).astype(x.dtype)


if __name__ == "__main__":
    keys = jax.random.split(jax.random.PRNGKey(0), 6)

    # Case 1: small shape matching the module (num_features = C = 32).
    N, C, L = 2, 32, 16
    x = jax.random.normal(keys[0], (N, C, L), dtype=jnp.float32)
    gamma = 1.0 + 0.1 * jax.random.normal(keys[1], (C,), dtype=jnp.float32)
    beta = 0.1 * jax.random.normal(keys[2], (C,), dtype=jnp.float32)

    out = jax.block_until_ready(layernorm1d(x, gamma, beta, eps=1e-5))
    ref = _reference(x, gamma, beta, eps=1e-5)
    assert out.shape == (N, C, L)
    assert jnp.allclose(out, ref, atol=1e-5, rtol=1e-5)

    # Case 2: exercises the L-tiled grid with a ragged tail (TL=128, L=200).
    N2, C2, L2 = 2, 32, 200
    x2 = jax.random.normal(keys[3], (N2, C2, L2), dtype=jnp.float32)
    gamma2 = 1.0 + 0.1 * jax.random.normal(keys[4], (C2,), dtype=jnp.float32)
    beta2 = 0.1 * jax.random.normal(keys[5], (C2,), dtype=jnp.float32)

    out2 = jax.block_until_ready(layernorm1d(x2, gamma2, beta2, eps=1e-5))
    ref2 = _reference(x2, gamma2, beta2, eps=1e-5)
    assert out2.shape == (N2, C2, L2)
    assert jnp.allclose(out2, ref2, atol=1e-5, rtol=1e-5)

    print("KERNEL_OK")
</pallas_src>

<mosaic_0001>
module attributes {stable_mosaic.version = 11 : i64} {
  func.func @_layernorm_kernel(%arg0: i32, %arg1: i32, %arg2: memref<1x32x16xf32, #tpu.memory_space<vmem>>, %arg3: memref<1x32x1xf32, #tpu.memory_space<vmem>>, %arg4: memref<1x32x1xf32, #tpu.memory_space<vmem>>, %arg5: memref<1x32x16xf32, #tpu.memory_space<vmem>>) attributes {dimension_semantics = [#tpu.dimension_semantics<parallel>, #tpu.dimension_semantics<parallel>], iteration_bounds = array<i64: 2, 1>, scalar_prefetch = 0 : i64, scratch_operands = 0 : i64, tpu.core_type = #tpu.core_type<tc>, window_params = [{transform_indices = @transform_0, window_bounds = array<i64: 1, 32, 16>}, {pipeline_mode = #tpu.pipeline_mode<synchronous>, transform_indices = @transform_1, window_bounds = array<i64: 1, 32, 1>}, {pipeline_mode = #tpu.pipeline_mode<synchronous>, transform_indices = @transform_2, window_bounds = array<i64: 1, 32, 1>}, {transform_indices = @transform_3, window_bounds = array<i64: 1, 32, 16>}]} {
    %c0 = arith.constant 0 : index
    %c0_0 = arith.constant 0 : index
    %c0_1 = arith.constant 0 : index
    %0 = vector.load %arg2[%c0, %c0_0, %c0_1] : memref<1x32x16xf32, #tpu.memory_space<vmem>>, vector<1x32x16xf32>
    %cst = arith.constant dense<0.000000e+00> : vector<1x16xf32>
    %1 = vector.multi_reduction <add>, %0, %cst [1] : vector<1x32x16xf32> to vector<1x16xf32>
    %2 = vector.shape_cast %1 : vector<1x16xf32> to vector<1x1x16xf32>
    %3 = arith.mulf %0, %0 : vector<1x32x16xf32>
    %cst_2 = arith.constant dense<0.000000e+00> : vector<1x16xf32>
    %4 = vector.multi_reduction <add>, %3, %cst_2 [1] : vector<1x32x16xf32> to vector<1x16xf32>
    %5 = vector.shape_cast %4 : vector<1x16xf32> to vector<1x1x16xf32>
    %cst_3 = arith.constant 3.125000e-02 : f32
    %6 = vector.broadcast %cst_3 : f32 to vector<1x1x16xf32>
    %7 = arith.mulf %2, %6 : vector<1x1x16xf32>
    %cst_4 = arith.constant 3.125000e-02 : f32
    %8 = vector.broadcast %cst_4 : f32 to vector<1x1x16xf32>
    %9 = arith.mulf %5, %8 : vector<1x1x16xf32>
    %10 = arith.mulf %7, %7 : vector<1x1x16xf32>
    %11 = arith.subf %9, %10 : vector<1x1x16xf32>
    %cst_5 = arith.constant 0.000000e+00 : f32
    %12 = vector.broadcast %cst_5 : f32 to vector<1x1x16xf32>
    %13 = arith.maximumf %11, %12 : vector<1x1x16xf32>
    %cst_6 = arith.constant 9.99999974E-6 : f32
    %14 = vector.broadcast %cst_6 : f32 to vector<1x1x16xf32>
    %15 = arith.addf %13, %14 : vector<1x1x16xf32>
    %16 = math.rsqrt %15 : vector<1x1x16xf32>
    %c0_7 = arith.constant 0 : index
    %c0_8 = arith.constant 0 : index
    %c0_9 = arith.constant 0 : index
    %17 = vector.load %arg3[%c0_7, %c0_8, %c0_9] : memref<1x32x1xf32, #tpu.memory_space<vmem>>, vector<1x32x1xf32>
    %c0_10 = arith.constant 0 : index
    %c0_11 = arith.constant 0 : index
    %c0_12 = arith.constant 0 : index
    %18 = vector.load %arg4[%c0_10, %c0_11, %c0_12] : memref<1x32x1xf32, #tpu.memory_space<vmem>>, vector<1x32x1xf32>
    %19 = vector.broadcast %7 : vector<1x1x16xf32> to vector<1x32x16xf32>
    %20 = arith.subf %0, %19 : vector<1x32x16xf32>
    %21 = vector.broadcast %16 : vector<1x1x16xf32> to vector<1x32x16xf32>
    %22 = arith.mulf %20, %21 : vector<1x32x16xf32>
    %23 = vector.broadcast %17 : vector<1x32x1xf32> to vector<1x32x16xf32>
    %24 = arith.mulf %22, %23 : vector<1x32x16xf32>
    %25 = vector.broadcast %18 : vector<1x32x1xf32> to vector<1x32x16xf32>
    %26 = arith.addf %24, %25 : vector<1x32x16xf32>
    %c0_13 = arith.constant 0 : index
    %c0_14 = arith.constant 0 : index
    %c0_15 = arith.constant 0 : index
    %27 = vector.load %arg5[%c0_13, %c0_14, %c0_15] : memref<1x32x16xf32, #tpu.memory_space<vmem>>, vector<1x32x16xf32>
    tpu.vector_store %arg5[%c0_13, %c0_14, %c0_15], %26 {strides = array<i32>} : memref<1x32x16xf32, #tpu.memory_space<vmem>>, vector<1x32x16xf32>,
    return
  }
  func.func @transform_0(%arg0: i32, %arg1: i32) -> (i32, i32, i32) {
    %c0_i32 = arith.constant 0 : i32
    %c0_i32_0 = arith.constant 0 : i32
    return %arg0, %c0_i32, %arg1 : i32, i32, i32
  }
  func.func @transform_1(%arg0: i32, %arg1: i32) -> (i32, i32, i32) {
    %c0_i32 = arith.constant 0 : i32
    %c0_i32_0 = arith.constant 0 : i32
    %c0_i32_1 = arith.constant 0 : i32
    %c0_i32_2 = arith.constant 0 : i32
    return %c0_i32, %c0_i32_0, %c0_i32_1 : i32, i32, i32
  }
  func.func @transform_2(%arg0: i32, %arg1: i32) -> (i32, i32, i32) {
    %c0_i32 = arith.constant 0 : i32
    %c0_i32_0 = arith.constant 0 : i32
    %c0_i32_1 = arith.constant 0 : i32
    %c0_i32_2 = arith.constant 0 : i32
    return %c0_i32, %c0_i32_0, %c0_i32_1 : i32, i32, i32
  }
  func.func @transform_3(%arg0: i32, %arg1: i32) -> (i32, i32, i32) {
    %c0_i32 = arith.constant 0 : i32
    %c0_i32_0 = arith.constant 0 : i32
    return %arg0, %c0_i32, %arg1 : i32, i32, i32
  }
}

</mosaic_0001>

<bundles_post_ra>
// kernel: tpu_custom_call.1
= control target key start
LH: loop header
LB: loop body
LE: loop exit
PB: predicated region body
PF: predicated region fallthrough
CT: control target
= control target key end

     0   :  { %s492_s12 = smov 0   ;;  %s494_s13 = smov 0   ;;  %s578_s0 = inlined_call_operand.vmem [shape: f32[2,32,16], index: 0, kind: input, shape index: {}]   ;;  %s579_s1 = inlined_call_operand.vmem [shape: f32[1,32,1], index: 1, kind: input, shape index: {}]   ;;  %s580_s2 = inlined_call_operand.vmem [shape: f32[1,32,1], index: 2, kind: input, shape index: {}]   ;;  %s581_s3 = inlined_call_operand.vmem [shape: f32[2,32,16], index: 3, kind: output, shape index: {}]  }
   0x1   :  { %s496_s14 = smov 0  }
   0x2 LB: > { %s25_s15 = sadd.s32 1, %s465_s13  ;;  %p408_p0 = scmp.ge.s32.totalorder %s469_s14, 1  ;;  %s469_s14 = sphi %s496_s14, %s13_s14   ;;  %s465_s13 = sphi %s494_s13, %s583_s13   ;;  %s461_s12 = sphi %s492_s12, %s582_s12  }
   0x3   : > { %p27_p1 = scmp.ge.s32.totalorder %s25_s15, 2  ;;  %p156_p2 = scmp.lt.s32.totalorder %s469_s14, 3 }
   0x5   : > { %s585_s15 = smov (%p27_p1, %s25_s15), 0  ;;  %p157_p3 = pnand %p408_p0, %p156_p2 }
   0x6   : > { %p186_p4 = scmp.lt.s32.totalorder (!%p157_p3), %s461_s12, 1 }
   0x7   : > { %160 = sbr.rel (%p157_p3) target bundleno = 149 (0x95), region = 32 }
   0xc   : > { %v255_v0 = vld [vmem:[%s579_s1 + $0x10] sm:$0xff]  ;;  %v253_v1 = vld [vmem:[%s579_s1] sm:$0xff]  ;;  %v471_v2 = vmov 0   ;;  %v256_v4 = vld [vmem:[%s579_s1 + $0x18] sm:$0xff]  ;;  %s587_s12 = smov (!%p186_p4, %s461_s12), 1  ;;  %vm206_vm0 = vcmask 130048  }
   0xd   : > { %443 = vset.pattern.permute.xlu1 %v471_v2  ;;  %442 = vset.pattern.permute.xlu0 %v471_v2  ;;  %v257_v3 = vld [vmem:[%s580_s2] sm:$0xff]  ;;  %v254_v5 = vld [vmem:[%s579_s1 + $0x8] sm:$0xff]  ;;  %v260_v7 = vld [vmem:[%s580_s2 + $0x18] sm:$0xff]  ;;  %s415_s5 = sshll.u32 %s587_s12, 5 }
   0xe   : > { %281 = vperm.xlu1 %443, %v255_v0   ;;  %271 = vperm.xlu0 %442, %v253_v1   ;;  %v258_v6 = vld [vmem:[%s580_s2 + $0x8] sm:$0xff]  ;;  %v259_v8 = vld [vmem:[%s580_s2 + $0x10] sm:$0xff]  ;;  %s193_s8 = scalar_lea.vmem %s578_s0, %s415_s5  ;;  %s201_s11 = scalar_lea.vmem %s581_s3, %s415_s5 }
   0xf   : > { %444 = vset.pattern.permute.xlu2 %v471_v2  ;;  %v202_v9 = vld [vmem:[%s193_s8] sm:$0xff]  ;;  %v203_v10 = vld [vmem:[%s193_s8 + $0x8] sm:$0xff]  ;;  %v548_v15 = vld [vmem:[%s193_s8 + $0x10] sm:$0xff] }
  0x10   : > { %295 = vperm.xlu2 %444, %v257_v3   ;;  %v207_v11 = vsel %vm206_vm0, %v202_v9, 0.0  ;;  %v208_v12 = vsel %vm206_vm0, %v203_v10, 0.0  ;;  %v220_v13 = vmul.f32 %v202_v9, %v202_v9  ;;  %v221_v14 = vmul.f32 %v203_v10, %v203_v10  ;;  %v205_v21 = vld [vmem:[%s193_s8 + $0x18] sm:$0xff] }
  0x11   : > { %v209_v16 = vadd.f32 %v208_v12, %v207_v11  ;;  %v210_v17 = vsel %vm206_vm0, %v548_v15, 0.0  ;;  %v222_v18 = vmul.f32 %v548_v15, %v548_v15  ;;  %v212_v24 = vsel %vm206_vm0, %v205_v21, 0.0 }
  0x12   : > { %v224_v19 = vsel %vm206_vm0, %v220_v13, 0.0  ;;  %v225_v20 = vsel %vm206_vm0, %v221_v14, 0.0  ;;  %v223_v25 = vmul.f32 %v205_v21, %v205_v21 }
  0x13   : > { %v211_v22 = vadd.f32 %v210_v17, %v209_v16  ;;  %v226_v23 = vadd.f32 %v225_v20, %v224_v19  ;;  %v227_v26 = vsel %vm206_vm0, %v222_v18, 0.0 }
  0x14   : > { %v229_v29 = vsel %vm206_vm0, %v223_v25, 0.0 }
  0x15   : > { %v213_v27 = vadd.f32 %v212_v24, %v211_v22  ;;  %v228_v28 = vadd.f32 %v227_v26, %v226_v23 }
  0x16   : > { %286 = vperm.xlu1 %443, %v256_v4   ;;  %276 = vperm.xlu0 %442, %v254_v5  }
  0x17   : > { %v214_v30 = vrot.slane %v213_v27, 4  ;;  %v230_v31 = vadd.f32 %v229_v29, %v228_v28 }
  0x18   : > { %300 = vperm.xlu2 %444, %v258_v6  }
  0x19   : > { %v215_v32 = vadd.f32 %v214_v30, %v213_v27  ;;  %v231_v33 = vrot.slane %v230_v31, 4 }
  0x1b   : > { %v216_v34 = vrot.slane %v215_v32, 2  ;;  %v232_v35 = vadd.f32 %v231_v33, %v230_v31 }
  0x1d   : > { %v217_v36 = vadd.f32 %v216_v34, %v215_v32  ;;  %v233_v37 = vrot.slane %v232_v35, 2 }
  0x1e   : > { %310 = vperm.xlu1 %443, %v260_v7   ;;  %305 = vperm.xlu0 %442, %v259_v8  }
  0x1f   : > { %v218_v38 = vrot.slane %v217_v36, 1  ;;  %v234_v39 = vadd.f32 %v233_v37, %v232_v35 }
  0x21   : > { %v219_v40 = vadd.f32 %v218_v38, %v217_v36  ;;  %v235_v41 = vrot.slane %v234_v39, 1 }
  0x23   : > { %v236_v42 = vadd.f32 %v235_v41, %v234_v39  ;;  %v237_v43 = vmul.f32 0.03125, %v219_v40 }
  0x25   : > { %v238_v44 = vmul.f32 0.03125, %v236_v42  ;;  %v239_v45 = vmul.f32 %v237_v43, %v237_v43  ;;  %v261_v55 = vsub.f32 %v202_v9, %v237_v43  ;;  %v262_v62 = vsub.f32 %v203_v10, %v237_v43 }
  0x26   : > { %v263_v1 = vsub.f32 %v548_v15, %v237_v43  ;;  %v264_v2 = vsub.f32 %v205_v21, %v237_v43 }
  0x27   : > { %v240_v46 = vsub.f32 %v238_v44, %v239_v45 }
  0x29   : > { %v241_v47 = vmax.f32 %v240_v46, 0.0 }
  0x2b   : > { %v242_v48 = vadd.f32 1e-05, %v241_v47 }
  0x2d   : > { %445 = vrsqrt.f32 %v242_v48  ;;  %vm249_vm1 = vweird.f32 %v242_v48 }
  0x33   : > { %v446_v49 = vpop.eup %445 }
  0x34   : > { %v244_v50 = vmul.f32 %v446_v49, %v242_v48  ;;  %vm250_vm2 = vweird.f32 %v446_v49 }
  0x35   : > { %vm251_vm3 = vmor %vm249_vm1, %vm250_vm2 }
  0x36   : > { %v245_v51 = vmul.f32 %v446_v49, %v244_v50 }
  0x38   : > { %v246_v52 = vmul.f32 0.5, %v245_v51 }
  0x3a   : > { %v247_v53 = vsub.f32 1.5, %v246_v52 }
  0x3c   : > { %v248_v54 = vmul.f32 %v446_v49, %v247_v53 }
  0x3e   : > { %v252_v56 = vsel %vm251_vm3, %v446_v49, %v248_v54 }
  0x3f   : > { %v265_v57 = vmul.f32 %v261_v55, %v252_v56  ;;  %v266_v0 = vmul.f32 %v262_v62, %v252_v56  ;;  %v267_v7 = vmul.f32 %v263_v1, %v252_v56  ;;  %v268_v8 = vmul.f32 %v264_v2, %v252_v56 }
  0x6a   : > { %v296_v58 = vpop.permute.xlu2 %295 }
  0x72   : > { %v301_v6 = vpop.permute.xlu2 %300 }
  0x80   : > { %v282_v59 = vpop.permute.xlu1 %281  ;;  %v272_v60 = vpop.permute.xlu0 %271 }
  0x81   : > { %v289_v61 = vmul.f32 %v272_v60, %v265_v57  ;;  %v291_v10 = vmul.f32 %v282_v59, %v267_v7 }
  0x83   : > { %v313_v63 = vadd.f32 %v296_v58, %v289_v61 }
  0x85   : > { %317 = vst.msk [vmem:[%s201_s11] sm:$0xff] %vm206_vm0, %v313_v63 }
  0x88   : > { %v287_v3 = vpop.permute.xlu1 %286  ;;  %v277_v4 = vpop.permute.xlu0 %276 }
  0x89   : > { %v290_v5 = vmul.f32 %v277_v4, %v266_v0  ;;  %v292_v11 = vmul.f32 %v287_v3, %v268_v8 }
  0x8b   : > { %v314_v9 = vadd.f32 %v301_v6, %v290_v5 }
  0x8d   : > { %318 = vst.msk [vmem:[%s201_s11 + $0x8] sm:$0xff] %vm206_vm0, %v314_v9 }
  0x90   : > { %v311_v12 = vpop.permute.xlu1 %310  ;;  %v306_v13 = vpop.permute.xlu0 %305 }
  0x91   : > { %v316_v14 = vadd.f32 %v311_v12, %v292_v11  ;;  %v315_v16 = vadd.f32 %v306_v13, %v291_v10 }
  0x93   : > { %320 = vst.msk [vmem:[%s201_s11 + $0x18] sm:$0xff] %vm206_vm0, %v316_v14 }
  0x94   : > { %319 = vst.msk [vmem:[%s201_s11 + $0x10] sm:$0xff] %vm206_vm0, %v315_v16 }
  0x95 PF: > { %s13_s14 = sadd.s32 1, %s469_s14   ;;  %s582_s12 = smov %s465_s13 }
  0x96   : > { %p10_p5 = scmp.ge.s32.totalorder %s13_s14, 4   ;;  %s583_s13 = smov %s585_s15 }
  0x98   :  { %12 = sbr.rel (!%p10_p5) target bundleno = 2 (0x2), region = 62 }

</bundles_post_ra>
